<compile_context>
chip_gen: v5e
topology: v5e:2x2
jax: 0.10.0
libtpu: 0.0.40
codegen_flags: <defaults>
</compile_context>

<pallas_src>
import jax
import jax.numpy as jnp
from jax.experimental import pallas as pl
from jax.experimental.pallas import tpu as pltpu


def edge_score_kernel(hu_ref, hv_ref, w_ref, b_ref, out_ref):
    # hu_ref, hv_ref: (D, TILE_E) feature-major endpoint tiles (edges on lanes)
    # w_ref: (D, 1) resident weight column; b_ref: (1,) bias scalar in SMEM
    prod = hu_ref[...] * hv_ref[...] * w_ref[...]            # (D, TILE_E)  VPU
    score = jnp.sum(prod, axis=0, keepdims=True)             # (1, TILE_E)  sublane reduce
    out_ref[...] = (score + b_ref[0]).astype(out_ref.dtype)  # lane-dense store


def slp_link_predictor(h, src, dst, w, b, *, tile_e=2048):
    """h: (N, D) f32; src/dst: (E,) int32; w: (1, D); b: (1,). Returns (E,) f32."""
    E = src.shape[0]
    N, D = h.shape

    # Edge tiling: tile_e must be a multiple of 128 (lane width); clamp so a
    # tiny graph doesn't pad to a huge tile, but keep >= 1 K edges when E is
    # large (grid-step overhead ~0.35 us would otherwise dominate).
    e_round = ((E + 127) // 128) * 128
    tile_e = max(128, (min(tile_e, e_round) // 128) * 128)
    e_pad = ((E + tile_e - 1) // tile_e) * tile_e
    pad = e_pad - E

    # Pad only the small index arrays (padded edges read node 0; their scores
    # are sliced off below).
    src_p = jnp.pad(src.astype(jnp.int32), (0, pad))
    dst_p = jnp.pad(dst.astype(jnp.int32), (0, pad))

    # Glue: data-dependent endpoint gather, emitted feature-major so the
    # kernel tiles are lane-dense in the edge dimension.
    ht = jnp.asarray(h, jnp.float32).T                       # (D, N)
    hu = jnp.take(ht, src_p, axis=1)                         # (D, e_pad)
    hv = jnp.take(ht, dst_p, axis=1)                         # (D, e_pad)

    w_col = jnp.asarray(w, jnp.float32).reshape(D, 1)        # (D, 1)
    b = jnp.asarray(b, jnp.float32).reshape(1)               # (1,)

    n_tiles = e_pad // tile_e

    out = pl.pallas_call(
        edge_score_kernel,
        out_shape=jax.ShapeDtypeStruct((1, e_pad), jnp.float32),
        grid_spec=pltpu.PrefetchScalarGridSpec(
            num_scalar_prefetch=0,
            grid=(n_tiles,),
            in_specs=[
                pl.BlockSpec((D, tile_e), lambda i: (0, i)),        # hu tile
                pl.BlockSpec((D, tile_e), lambda i: (0, i)),        # hv tile
                pl.BlockSpec((D, 1), lambda i: (0, 0)),             # weight (resident)
                pl.BlockSpec(memory_space=pltpu.MemorySpace.SMEM),  # bias scalar
            ],
            out_specs=pl.BlockSpec((1, tile_e), lambda i: (0, i)),  # lane-dense scores
        ),
        compiler_params=pltpu.CompilerParams(
            dimension_semantics=("parallel",),       # v7x: shard tiles over 2 TCs
            vmem_limit_bytes=32 * 1024 * 1024,       # safe headroom on v5e/v6e/v7x
        ),
        cost_estimate=pl.CostEstimate(
            flops=3 * e_pad * D,                     # 2 muls + 1 add per element
            transcendentals=0,
            bytes_accessed=2 * e_pad * D * 4 + e_pad * 4 + D * 4,
        ),
    )(hu, hv, w_col, b)

    return out[0, :E]                                         # squeeze(1), drop pad


if __name__ == "__main__":
    key = jax.random.PRNGKey(0)
    k_h, k_src, k_dst, k_w, k_b = jax.random.split(key, 5)

    # Small shapes: N=16 nodes, h_feats=32, E=8 edges.
    N, D, E = 16, 32, 8
    h = jax.random.normal(k_h, (N, D), dtype=jnp.float32)
    src = jax.random.randint(k_src, (E,), 0, N, dtype=jnp.int32)
    dst = jax.random.randint(k_dst, (E,), 0, N, dtype=jnp.int32)

    # Deterministic nn.Linear(h_feats, 1) init (PyTorch-style uniform bound).
    bound = 1.0 / (D ** 0.5)
    w = jax.random.uniform(k_w, (1, D), minval=-bound, maxval=bound,
                           dtype=jnp.float32)
    b = jax.random.uniform(k_b, (1,), minval=-bound, maxval=bound,
                           dtype=jnp.float32)

    scores = jax.block_until_ready(slp_link_predictor(h, src, dst, w, b))

    # Pure-JAX reference for correctness.
    ref = ((h[src] * h[dst]) @ w.reshape(D, 1) + b)[:, 0]     # (E,)
    assert scores.shape == (E,)
    assert jnp.allclose(scores, ref, atol=1e-5, rtol=1e-5)

    print("KERNEL_OK")
</pallas_src>

<mosaic_0001>
module attributes {stable_mosaic.version = 11 : i64} {
  func.func @edge_score_kernel(%arg0: i32, %arg1: memref<32x128xf32, #tpu.memory_space<vmem>>, %arg2: memref<32x128xf32, #tpu.memory_space<vmem>>, %arg3: memref<32x1xf32, #tpu.memory_space<vmem>>, %arg4: memref<1xf32, #tpu.memory_space<smem>>, %arg5: memref<1x128xf32, #tpu.memory_space<vmem>>) attributes {dimension_semantics = [#tpu.dimension_semantics<parallel>], iteration_bounds = array<i64: 1>, scalar_prefetch = 0 : i64, scratch_operands = 0 : i64, tpu.core_type = #tpu.core_type<tc>, window_params = [{transform_indices = @transform_0, window_bounds = array<i64: 32, 128>}, {transform_indices = @transform_1, window_bounds = array<i64: 32, 128>}, {pipeline_mode = #tpu.pipeline_mode<synchronous>, transform_indices = @transform_2, window_bounds = array<i64: 32, 1>}, {transform_indices = @transform_3, window_bounds = array<i64: 1>}, {transform_indices = @transform_4, window_bounds = array<i64: 1, 128>}]} {
    %c0 = arith.constant 0 : index
    %c0_0 = arith.constant 0 : index
    %0 = vector.load %arg1[%c0, %c0_0] : memref<32x128xf32, #tpu.memory_space<vmem>>, vector<32x128xf32>
    %c0_1 = arith.constant 0 : index
    %c0_2 = arith.constant 0 : index
    %1 = vector.load %arg2[%c0_1, %c0_2] : memref<32x128xf32, #tpu.memory_space<vmem>>, vector<32x128xf32>
    %2 = arith.mulf %0, %1 : vector<32x128xf32>
    %c0_3 = arith.constant 0 : index
    %c0_4 = arith.constant 0 : index
    %3 = vector.load %arg3[%c0_3, %c0_4] : memref<32x1xf32, #tpu.memory_space<vmem>>, vector<32x1xf32>
    %4 = vector.broadcast %3 : vector<32x1xf32> to vector<32x128xf32>
    %5 = arith.mulf %2, %4 : vector<32x128xf32>
    %cst = arith.constant dense<0.000000e+00> : vector<128xf32>
    %6 = vector.multi_reduction <add>, %5, %cst [0] : vector<32x128xf32> to vector<128xf32>
    %7 = vector.shape_cast %6 : vector<128xf32> to vector<1x128xf32>
    %c0_5 = arith.constant 0 : index
    %8 = memref.load %arg4[%c0_5] : memref<1xf32, #tpu.memory_space<smem>>
    %9 = vector.broadcast %8 : f32 to vector<1x128xf32>
    %10 = arith.addf %7, %9 : vector<1x128xf32>
    %c0_6 = arith.constant 0 : index
    %c0_7 = arith.constant 0 : index
    %11 = vector.load %arg5[%c0_6, %c0_7] : memref<1x128xf32, #tpu.memory_space<vmem>>, vector<1x128xf32>
    tpu.vector_store %arg5[%c0_6, %c0_7], %10 {strides = array<i32>} : memref<1x128xf32, #tpu.memory_space<vmem>>, vector<1x128xf32>,
    return
  }
  func.func @transform_0(%arg0: i32) -> (i32, i32) {
    %c0_i32 = arith.constant 0 : i32
    %c0_i32_0 = arith.constant 0 : i32
    return %c0_i32, %arg0 : i32, i32
  }
  func.func @transform_1(%arg0: i32) -> (i32, i32) {
    %c0_i32 = arith.constant 0 : i32
    %c0_i32_0 = arith.constant 0 : i32
    return %c0_i32, %arg0 : i32, i32
  }
  func.func @transform_2(%arg0: i32) -> (i32, i32) {
    %c0_i32 = arith.constant 0 : i32
    %c0_i32_0 = arith.constant 0 : i32
    %c0_i32_1 = arith.constant 0 : i32
    return %c0_i32, %c0_i32_0 : i32, i32
  }
  func.func @transform_3(%arg0: i32) -> i32 {
    %c0_i32 = arith.constant 0 : i32
    %c0_i32_0 = arith.constant 0 : i32
    return %c0_i32 : i32
  }
  func.func @transform_4(%arg0: i32) -> (i32, i32) {
    %c0_i32 = arith.constant 0 : i32
    %c0_i32_0 = arith.constant 0 : i32
    return %c0_i32, %arg0 : i32, i32
  }
}

</mosaic_0001>

<bundles_post_ra>
// kernel: tpu_custom_call.1
= control target key start
LH: loop header
LB: loop body
LE: loop exit
PB: predicated region body
PF: predicated region fallthrough
CT: control target
= control target key end

     0   :  { %10 = vsyncpa [#allocation4], 0  ;;  %s227_s0 = inlined_call_operand.vmem [shape: f32[32,128], index: 0, kind: input, shape index: {}]   ;;  %s228_s1 = inlined_call_operand.hbm [shape: f32[32,128], index: 1, kind: input, shape index: {}]   ;;  %s229_s2 = inlined_call_operand.vmem [shape: f32[32,1], index: 2, kind: input, shape index: {}]   ;;  %s230_s3 = inlined_call_operand.<no memory space> [shape: f32[1], index: 3, kind: input, shape index: {}]   ;;  %s231_s4 = inlined_call_operand.hbm [shape: f32[1,128], index: 4, kind: output, shape index: {}]  }
   0x1   :  { %11 = vsyncpa [#allocation5], 0  ;;  %s18_s17 = sshll.u32 %s228_s1, 4  ;;  %s164_s18 = smov [#allocation3]   ;;  %s19_s17 = int_to_ptr.hbm [resolvable:$true] %s18_s17 }
   0x2   :  { %s20_s19 = sshll.u32 %s164_s18, 4  ;;  %s165_s20 = smov 128   ;;  %s21_s19 = int_to_ptr.vmem [resolvable:$true] %s20_s19 }
   0x3   :  { %s166_s21 = smov 8  }
   0x4   :  { %26 = dma.hbm_to_vmem [thread:$0]  %s19_s17, 512, %s21_s19, [#allocation4], %s165_s20, %s165_s20, %s166_s21  }
   0x5   :  { %160 = dma.done.wait [#allocation4], 512  }
   0x6   :  { %161 = vsyncadd [#allocation4], 4294966784  ;;  %v167_v0 = vmov 0   ;;  %v49_v1 = vld [vmem:[%s229_s2 + $0x10] sm:$0xff]  ;;  %v47_v2 = vld [vmem:[%s229_s2] sm:$0xff]  ;;  %v85_v33 = vstv %s230_s3  ;;  %s95_s15 = sshll.u32 %s231_s4, 4  ;;  %s96_s15 = int_to_ptr.hbm [resolvable:$true] %s95_s15 }
   0x7   :  { %111 = vset.pattern.permute.xlu1 %v167_v0  ;;  %110 = vset.pattern.permute.xlu0 %v167_v0  ;;  %v50_v3 = vld [vmem:[%s229_s2 + $0x18] sm:$0xff]  ;;  %v48_v4 = vld [vmem:[%s229_s2 + $0x8] sm:$0xff]  ;;  %v35_v7 = vld [vmem:[%s227_s0] sm:$0xff] }
   0x8   :  { %63 = vperm.xlu1 %111, %v49_v1   ;;  %53 = vperm.xlu0 %110, %v47_v2   ;;  %v39_v8 = vld [vmem:[#allocation3] sm:$0xff]  ;;  %v36_v9 = vld [vmem:[%s227_s0 + $0x8] sm:$0xff]  ;;  %v37_v11 = vld [vmem:[%s227_s0 + $0x10] sm:$0xff] }
   0x9   :  { %v40_v10 = vld [vmem:[#allocation3 + $0x8] sm:$0xff]  ;;  %v41_v12 = vld [vmem:[#allocation3 + $0x10] sm:$0xff]  ;;  %v43_v13 = vmul.f32 %v39_v8, %v35_v7  ;;  %v38_v15 = vld [vmem:[%s227_s0 + $0x18] sm:$0xff]  ;;  %s168_s0 = smov [#allocation6]  }
   0xa   :  { %v44_v14 = vmul.f32 %v40_v10, %v36_v9  ;;  %v42_v16 = vld [vmem:[#allocation3 + $0x18] sm:$0xff]  ;;  %v45_v17 = vmul.f32 %v41_v12, %v37_v11  ;;  %s93_s12 = sshll.u32 %s168_s0, 4  ;;  %s94_s12 = int_to_ptr.vmem [resolvable:$true] %s93_s12 }
   0xb   :  { %v46_v20 = vmul.f32 %v42_v16, %v38_v15 }
  0x10   :  { %68 = vperm.xlu1 %111, %v50_v3   ;;  %58 = vperm.xlu0 %110, %v48_v4  }
  0x7a   :  { %v64_v5 = vpop.permute.xlu1 %63  ;;  %v54_v6 = vpop.permute.xlu0 %53 }
  0x7b   :  { %v71_v19 = vmul.f32 %v54_v6, %v43_v13  ;;  %v73_v23 = vmul.f32 %v64_v5, %v45_v17 }
  0x82   :  { %v59_v18 = vpop.permute.xlu0 %58  ;;  %v69_v22 = vpop.permute.xlu1 %68 }
  0x83   :  { %v72_v21 = vmul.f32 %v59_v18, %v44_v14  ;;  %v74_v25 = vmul.f32 %v69_v22, %v46_v20 }
  0x85   :  { %v75_v24 = vadd.f32 %v72_v21, %v71_v19 }
  0x87   :  { %v76_v26 = vadd.f32 %v75_v24, %v73_v23 }
  0x89   :  { %v77_v27 = vadd.f32 %v76_v26, %v74_v25 }
  0x8b   :  { %v78_v28 = vrot.slane %v77_v27, 4 }
  0x8d   :  { %v79_v29 = vadd.f32 %v78_v28, %v77_v27 }
  0x8f   :  { %v80_v30 = vrot.slane %v79_v29, 2 }
  0x91   :  { %v81_v31 = vadd.f32 %v80_v30, %v79_v29 }
  0x93   :  { %v82_v32 = vrot.slane %v81_v31, 1 }
  0x95   :  { %v83_v34 = vadd.f32 %v82_v32, %v81_v31 }
  0x97   :  { %v86_v35 = vadd.f32 %v85_v33, %v83_v34 }
  0x99   :  { %87 = vst [vmem:[#allocation6] sm:$0x1] %v86_v35 }
  0x9a   :  { %98 = dma.vmem_to_hbm [thread:$0]  %s94_s12, 16, %s96_s15, [#allocation5]  }
  0x9b   :  { %162 = dma.done.wait [#allocation5], 16  }
  0x9c   :  { %163 = vsyncadd [#allocation5], 4294967280 }
  0x9d   :  { %103 = vsyncpa [#allocation4], 1 }
  0x9e   :  { %104 = vsyncpa [#allocation5], 1 }

</bundles_post_ra>
